<compile_context>
chip_gen: v7x
topology: tpu7x:2x2x1
jax: 0.10.0
libtpu: 0.0.40
codegen_flags: <defaults>
</compile_context>

<pallas_src>
import functools

import jax
import jax.numpy as jnp
from jax.experimental import pallas as pl
from jax.experimental.pallas import tpu as pltpu


# ------------------------------ hardware budget ------------------------------ #

@functools.lru_cache(maxsize=None)
def _vmem_limit_bytes():
    """Per-generation VMEM limit: ~5/8 of physical, capped at 100 MiB.
    v5e/v6e (128 MiB) -> 80 MiB; v7x (64 MiB) -> 40 MiB; fallback is the
    conservative v7x figure if the query is unavailable."""
    phys = 64 * 1024 * 1024
    try:
        phys = int(pltpu.get_tpu_info().vmem_capacity_bytes)
    except Exception:
        pass
    return int(min(100 * 1024 * 1024, phys * 5 // 8))


def _compiler_params():
    return pltpu.CompilerParams(
        dimension_semantics=("parallel",),
        vmem_limit_bytes=_vmem_limit_bytes(),
    )


def _pick_row_tile(n_rows, n_batch, bytes_per_row, vmem_budget, target_steps=8):
    """Largest divisor of n_rows that fits the VMEM budget; prefer tiles that
    still leave >= target_steps grid steps (pipeline ramp + v7x dual-TC)."""
    divisors = [d for d in range(1, n_rows + 1) if n_rows % d == 0]
    fits = [d for d in divisors if d * bytes_per_row <= vmem_budget] or [1]
    enough = [d for d in fits if n_batch * (n_rows // d) >= target_steps]
    return max(enough) if enough else max(fits)


def _full_spec(shape):
    return pl.BlockSpec(shape, lambda i, _n=len(shape): (0,) * _n)


# ------------------------------ Pallas kernels ------------------------------ #

def _conv1_expand_kernel(p00, p01, p10, p11, w1_ref, b1_ref, we_ref, be_ref,
                         o_ref):
    """Fused [dense 3x3 s2 conv + BN + ReLU] -> [expand 1x1 + BN + ReLU on the
    upper channel half].

    p_ab : (1, TR+1, WO+1, Cin) bf16 parity plane: plane[h,w] == x_pad[2h+a, 2w+b]
    w1   : (9*Cin, stem)        bf16, BN scale folded, tap-major (kh,kw,ci) rows
    b1   : (1, stem)            f32 folded BN shift
    we   : (bc, mid)            bf16 expand weight (BN folded)
    be   : (1, mid)             f32 expand BN shift
    o    : (1, TR*WO, bc+mid)   bf16: [conv1[..., :bc], expand(conv1[..., bc:])]
    """
    trp1, wop1, cin = p00.shape[1], p00.shape[2], p00.shape[3]
    tr, wo = trp1 - 1, wop1 - 1
    planes = (p00, p01, p10, p11)

    # Assemble the (pix, 9*Cin) tap matrix -> ONE MXU matmul (bf16 operands).
    taps = []
    for kh in range(3):
        for kw in range(3):
            pa, dh = kh % 2, kh // 2
            pb, dw = kw % 2, kw // 2
            t = planes[pa * 2 + pb][0, dh:dh + tr, dw:dw + wo, :]
            taps.append(t.reshape(tr * wo, cin))
    lhs = jnp.concatenate(taps, axis=-1)                       # (pix, 9*Cin) bf16

    y = jnp.dot(lhs, w1_ref[...], preferred_element_type=jnp.float32)
    y = jnp.maximum(y + b1_ref[...], 0.0)                      # f32 VPU epilogue

    bc = we_ref.shape[0]
    x2 = y[:, bc:].astype(we_ref.dtype)                        # bf16 MXU operand
    x2e = jnp.dot(x2, we_ref[...], preferred_element_type=jnp.float32)
    x2e = jnp.maximum(x2e + be_ref[...], 0.0)                  # expand + BN + ReLU

    o_ref[0] = jnp.concatenate([y[:, :bc], x2e], axis=-1).astype(o_ref.dtype)


def _branches_kernel(p00, p01, p10, p11, wdw_ref, bdw_ref, wpw_ref, bpw_ref,
                     o_ref):
    """Fused [both branches' depthwise 3x3 s2 + BN (no act)] -> [combined 1x1
    + BN + ReLU, with channel_shuffle folded into the weight columns].

    p_ab : (1, TR+1, WO+1, C1) bf16 parity planes of [x1 | expanded x2]
    wdw  : (9, 1, C1)          f32 depthwise taps (branch1 | main), BN folded
    bdw  : (1, C1)             f32 depthwise BN shifts
    wpw  : (C1, out_c)         bf16 block-diag [b1 1x1 | linear 1x1], columns
                               pre-permuted to the channel-shuffled order
    bpw  : (1, out_c)          f32 shuffled BN shifts
    o    : (1, TR*WO, out_c)   f32 final (already shuffled) output tile
    The depthwise intermediates never leave VMEM.
    """
    trp1, wop1, c1 = p00.shape[1], p00.shape[2], p00.shape[3]
    tr, wo = trp1 - 1, wop1 - 1
    planes = (p00, p01, p10, p11)

    acc = jnp.zeros((tr * wo, c1), jnp.float32)                # VPU path -> f32
    for kh in range(3):
        for kw in range(3):
            pa, dh = kh % 2, kh // 2
            pb, dw = kw % 2, kw // 2
            t = planes[pa * 2 + pb][0, dh:dh + tr, dw:dw + wo, :]
            acc = acc + t.astype(jnp.float32).reshape(tr * wo, c1) \
                * wdw_ref[kh * 3 + kw]
    ydw = (acc + bdw_ref[...]).astype(wpw_ref.dtype)           # dw + BN, no act

    out = jnp.dot(ydw, wpw_ref[...], preferred_element_type=jnp.float32)
    out = jnp.maximum(out + bpw_ref[...], 0.0)                 # both 1x1s + shuffle
    o_ref[0] = out.astype(o_ref.dtype)


# --------------------------- layout glue (XLA side) -------------------------- #

def _blocked_parity_planes(x, tr):
    """Split x (N,H,W,C) -- input of a 3x3/stride-2/pad-1 conv -- into its 4
    stride-2 parity planes, blocked along output rows with a 1-row halo.

    Returns 4 arrays of shape (N*NB, TR+1, WO+1, C) with
      plane[a*2+b][n*NB+rb, i, j, :] == x_zeropad[n, 2*(rb*TR+i)+a, 2*j+b, :]
    """
    N, H, W, C = x.shape
    Ho, Wo = (H + 1) // 2, (W + 1) // 2
    nb = Ho // tr
    Hp, Wp = 2 * Ho + 2, 2 * Wo + 2
    xp = jnp.pad(x, ((0, 0), (1, Hp - H - 1), (1, Wp - W - 1), (0, 0)))
    xp = xp.reshape(N, Ho + 1, 2, Wo + 1, 2, C)
    planes = []
    for a in range(2):
        for b in range(2):
            p = xp[:, :, a, :, b, :]                           # (N, Ho+1, Wo+1, C)
            pb = jnp.stack([p[:, r * tr:r * tr + tr + 1] for r in range(nb)],
                           axis=1)
            planes.append(pb.reshape(N * nb, tr + 1, Wo + 1, C))
    return planes, Ho, Wo, nb


# ------------------------------- stage wrappers ------------------------------ #

def _conv1_expand(x, params):
    """x (N,H,W,Cin) bf16 -> (N,Ho,Wo, bc+mid) bf16 via one pallas_call."""
    N, H, W, cin = x.shape
    stem = params["conv1_b"].shape[1]
    bc, mid = params["exp_w"].shape
    c1 = bc + mid
    Ho, Wo = (H + 1) // 2, (W + 1) // 2

    row_bytes = (4 * (Wo + 1) * cin * 2 + Wo * c1 * 2) * 2 \
        + Wo * (9 * cin * 2 + stem * 4 + mid * 4 + c1 * 2)
    tr = _pick_row_tile(Ho, N, row_bytes, _vmem_limit_bytes() // 2)
    planes, Ho, Wo, nb = _blocked_parity_planes(x, tr)

    plane_spec = pl.BlockSpec((1, tr + 1, Wo + 1, cin), lambda i: (i, 0, 0, 0))
    out = pl.pallas_call(
        _conv1_expand_kernel,
        out_shape=jax.ShapeDtypeStruct((N * nb, tr * Wo, c1), jnp.bfloat16),
        grid=(N * nb,),
        in_specs=[plane_spec] * 4 + [
            _full_spec((9 * cin, stem)), _full_spec((1, stem)),
            _full_spec((bc, mid)), _full_spec((1, mid)),
        ],
        out_specs=pl.BlockSpec((1, tr * Wo, c1), lambda i: (i, 0, 0)),
        compiler_params=_compiler_params(),
    )(*planes, params["conv1_w"], params["conv1_b"],
      params["exp_w"], params["exp_b"])
    return out.reshape(N, Ho, Wo, c1)


def _branches(z, params):
    """z (N,Ho,Wo,C1) bf16 -> final (N,Ho2,Wo2,out_c) f32 (already shuffled)."""
    N, Ho, Wo, c1 = z.shape
    out_c = params["pw_b"].shape[1]
    Ho2, Wo2 = (Ho + 1) // 2, (Wo + 1) // 2

    row_bytes = (4 * (Wo2 + 1) * c1 * 2 + Wo2 * out_c * 4) * 2 \
        + Wo2 * (c1 * 4 + c1 * 2 + out_c * 4)
    tr = _pick_row_tile(Ho2, N, row_bytes, _vmem_limit_bytes() // 2)
    planes, Ho2, Wo2, nb = _blocked_parity_planes(z, tr)

    plane_spec = pl.BlockSpec((1, tr + 1, Wo2 + 1, c1), lambda i: (i, 0, 0, 0))
    out = pl.pallas_call(
        _branches_kernel,
        out_shape=jax.ShapeDtypeStruct((N * nb, tr * Wo2, out_c), jnp.float32),
        grid=(N * nb,),
        in_specs=[plane_spec] * 4 + [
            _full_spec((9, 1, c1)), _full_spec((1, c1)),
            _full_spec((c1, out_c)), _full_spec((1, out_c)),
        ],
        out_specs=pl.BlockSpec((1, tr * Wo2, out_c), lambda i: (i, 0, 0)),
        compiler_params=_compiler_params(),
    )(*planes, params["dw_w"], params["dw_b"], params["pw_w"], params["pw_b"])
    return out.reshape(N, Ho2, Wo2, out_c)


# --------------------------- parameter construction -------------------------- #

def _fold_bn(gamma, beta, mean, var, eps=1e-5):
    scale = gamma / jnp.sqrt(var + eps)
    return scale, beta - mean * scale


def _random_bn(key, c):
    kg, kb, km, kv = jax.random.split(key, 4)
    gamma = jax.random.uniform(kg, (c,), jnp.float32, 0.5, 1.5)
    beta = 0.1 * jax.random.normal(kb, (c,), jnp.float32)
    mean = 0.1 * jax.random.normal(km, (c,), jnp.float32)
    var = jax.random.uniform(kv, (c,), jnp.float32, 0.5, 1.5)
    return _fold_bn(gamma, beta, mean, var)


def init_stem_params(key, in_channels, stem_channels, out_channels, expand_ratio):
    mid = int(round(stem_channels * expand_ratio))
    bc = stem_channels // 2
    if stem_channels == out_channels:
        inc = out_channels - bc
        lin_out = bc
    else:
        inc = out_channels - stem_channels
        lin_out = stem_channels
    assert out_channels % 2 == 0 and inc + lin_out == out_channels
    c1 = bc + mid

    ks = jax.random.split(key, 12)
    normal = lambda k, s: 0.1 * jax.random.normal(k, s, jnp.float32)

    # conv1: 3x3 s2 (tap-major rows), BN scale folded in f32, weights cast bf16.
    w1 = normal(ks[0], (9, in_channels, stem_channels))
    s1, sh1 = _random_bn(ks[1], stem_channels)
    conv1_w = (w1 * s1).reshape(9 * in_channels, stem_channels).astype(jnp.bfloat16)
    conv1_b = sh1.reshape(1, stem_channels)

    # expand 1x1 (main branch).
    we = normal(ks[2], (bc, mid))
    se, she = _random_bn(ks[3], mid)
    exp_w = (we * se).astype(jnp.bfloat16)
    exp_b = she.reshape(1, mid)

    # depthwise 3x3 s2: branch1 (bc ch) and main (mid ch) combined per tap.
    wd1 = normal(ks[4], (9, bc))
    sd1, shd1 = _random_bn(ks[5], bc)
    wdm = normal(ks[6], (9, mid))
    sdm, shdm = _random_bn(ks[7], mid)
    dw_w = jnp.concatenate([wd1 * sd1, wdm * sdm], axis=1).reshape(9, 1, c1)
    dw_b = jnp.concatenate([shd1, shdm]).reshape(1, c1)

    # pointwise: block-diag [branch1 1x1 | linear 1x1], columns permuted so the
    # matmul output is already channel_shuffle(..., groups=2)-ordered.
    wp1 = normal(ks[8], (bc, inc))
    sp1, shp1 = _random_bn(ks[9], inc)
    wpl = normal(ks[10], (mid, lin_out))
    spl, shpl = _random_bn(ks[11], lin_out)
    wcat = jnp.zeros((c1, out_channels), jnp.float32)
    wcat = wcat.at[:bc, :inc].set(wp1 * sp1)
    wcat = wcat.at[bc:, inc:].set(wpl * spl)
    bcat = jnp.concatenate([shp1, shpl])
    cpg = out_channels // 2
    perm = jnp.array([g * cpg + m for m in range(cpg) for g in range(2)],
                     jnp.int32)
    pw_w = wcat[:, perm].astype(jnp.bfloat16)
    pw_b = bcat[perm].reshape(1, out_channels)

    return {
        "conv1_w": conv1_w, "conv1_b": conv1_b,
        "exp_w": exp_w, "exp_b": exp_b,
        "dw_w": dw_w, "dw_b": dw_b,
        "pw_w": pw_w, "pw_b": pw_b,
    }


# -------------------------------- Stem forward ------------------------------- #

@jax.jit
def stem_forward(x_nchw, params):
    # NCHW at the boundary, NHWC inside; activations stored bf16 between kernels.
    x = jnp.transpose(x_nchw, (0, 2, 3, 1)).astype(jnp.bfloat16)

    # Kernel A: conv1 (3x3 s2 + BN + ReLU) fused with the expand 1x1 on the
    # upper channel half -> z = [x1 | relu(expand(x2))].
    z = _conv1_expand(x, params)

    # Kernel B: both depthwise 3x3 s2 convs + combined pointwise (+shuffle).
    out = _branches(z, params)                       # (N, Ho2, Wo2, out_c) f32

    return jnp.transpose(out, (0, 3, 1, 2))          # back to NCHW, float32


# ----------------------------------- main ------------------------------------ #

if __name__ == "__main__":
    # Stem config: in=4, stem=8, out=16, expand_ratio=1.0 (stem_quarter=True).
    IN_CHANNELS, STEM_CHANNELS, OUT_CHANNELS, EXPAND = 4, 8, 16, 1.0
    N, H, W = 2, 16, 16

    root = jax.random.PRNGKey(0)
    k_params, k_input = jax.random.split(root)

    params = init_stem_params(k_params, IN_CHANNELS, STEM_CHANNELS,
                              OUT_CHANNELS, EXPAND)
    x = jax.random.normal(k_input, (N, IN_CHANNELS, H, W), jnp.float32)

    out = jax.block_until_ready(stem_forward(x, params))

    expected = (N, OUT_CHANNELS, H // 4, W // 4)
    assert out.shape == expected, (out.shape, expected)
    assert out.dtype == jnp.float32
    print("KERNEL_OK")
</pallas_src>

<mosaic_0001>
module attributes {stable_mosaic.version = 11 : i64} {
  func.func @_conv1_expand_kernel(%arg0: i32, %arg1: memref<1x3x9x4xbf16, #tpu.memory_space<vmem>>, %arg2: memref<1x3x9x4xbf16, #tpu.memory_space<vmem>>, %arg3: memref<1x3x9x4xbf16, #tpu.memory_space<vmem>>, %arg4: memref<1x3x9x4xbf16, #tpu.memory_space<vmem>>, %arg5: memref<36x8xbf16, #tpu.memory_space<vmem>>, %arg6: memref<1x8xf32, #tpu.memory_space<vmem>>, %arg7: memref<4x8xbf16, #tpu.memory_space<vmem>>, %arg8: memref<1x8xf32, #tpu.memory_space<vmem>>, %arg9: memref<1x16x12xbf16, #tpu.memory_space<vmem>>) attributes {dimension_semantics = [#tpu.dimension_semantics<parallel>], iteration_bounds = array<i64: 8>, scalar_prefetch = 0 : i64, scratch_operands = 0 : i64, tpu.core_type = #tpu.core_type<tc>, window_params = [{transform_indices = @transform_0, window_bounds = array<i64: 1, 3, 9, 4>}, {transform_indices = @transform_1, window_bounds = array<i64: 1, 3, 9, 4>}, {transform_indices = @transform_2, window_bounds = array<i64: 1, 3, 9, 4>}, {transform_indices = @transform_3, window_bounds = array<i64: 1, 3, 9, 4>}, {pipeline_mode = #tpu.pipeline_mode<synchronous>, transform_indices = @transform_4, window_bounds = array<i64: 36, 8>}, {pipeline_mode = #tpu.pipeline_mode<synchronous>, transform_indices = @transform_5, window_bounds = array<i64: 1, 8>}, {pipeline_mode = #tpu.pipeline_mode<synchronous>, transform_indices = @transform_6, window_bounds = array<i64: 4, 8>}, {pipeline_mode = #tpu.pipeline_mode<synchronous>, transform_indices = @transform_7, window_bounds = array<i64: 1, 8>}, {transform_indices = @transform_8, window_bounds = array<i64: 1, 16, 12>}]} {
    %c0 = arith.constant 0 : index
    %c0_0 = arith.constant 0 : index
    %c0_1 = arith.constant 0 : index
    %c0_2 = arith.constant 0 : index
    %0 = vector.load %arg1[%c0, %c0_0, %c0_1, %c0_2] : memref<1x3x9x4xbf16, #tpu.memory_space<vmem>>, vector<1x2x8x4xbf16>
    %1 = vector.shape_cast %0 : vector<1x2x8x4xbf16> to vector<2x8x4xbf16>
    %2 = vector.shape_cast %1 : vector<2x8x4xbf16> to vector<16x4xbf16>
    %c0_3 = arith.constant 0 : index
    %c0_4 = arith.constant 0 : index
    %c0_5 = arith.constant 0 : index
    %c0_6 = arith.constant 0 : index
    %3 = vector.load %arg2[%c0_3, %c0_4, %c0_5, %c0_6] : memref<1x3x9x4xbf16, #tpu.memory_space<vmem>>, vector<1x2x8x4xbf16>
    %4 = vector.shape_cast %3 : vector<1x2x8x4xbf16> to vector<2x8x4xbf16>
    %5 = vector.shape_cast %4 : vector<2x8x4xbf16> to vector<16x4xbf16>
    %c0_7 = arith.constant 0 : index
    %c0_8 = arith.constant 0 : index
    %c1 = arith.constant 1 : index
    %c0_9 = arith.constant 0 : index
    %6 = vector.load %arg1[%c0_7, %c0_8, %c1, %c0_9] : memref<1x3x9x4xbf16, #tpu.memory_space<vmem>>, vector<1x2x8x4xbf16>
    %7 = vector.shape_cast %6 : vector<1x2x8x4xbf16> to vector<2x8x4xbf16>
    %8 = vector.shape_cast %7 : vector<2x8x4xbf16> to vector<16x4xbf16>
    %c0_10 = arith.constant 0 : index
    %c0_11 = arith.constant 0 : index
    %c0_12 = arith.constant 0 : index
    %c0_13 = arith.constant 0 : index
    %9 = vector.load %arg3[%c0_10, %c0_11, %c0_12, %c0_13] : memref<1x3x9x4xbf16, #tpu.memory_space<vmem>>, vector<1x2x8x4xbf16>
    %10 = vector.shape_cast %9 : vector<1x2x8x4xbf16> to vector<2x8x4xbf16>
    %11 = vector.shape_cast %10 : vector<2x8x4xbf16> to vector<16x4xbf16>
    %c0_14 = arith.constant 0 : index
    %c0_15 = arith.constant 0 : index
    %c0_16 = arith.constant 0 : index
    %c0_17 = arith.constant 0 : index
    %12 = vector.load %arg4[%c0_14, %c0_15, %c0_16, %c0_17] : memref<1x3x9x4xbf16, #tpu.memory_space<vmem>>, vector<1x2x8x4xbf16>
    %13 = vector.shape_cast %12 : vector<1x2x8x4xbf16> to vector<2x8x4xbf16>
    %14 = vector.shape_cast %13 : vector<2x8x4xbf16> to vector<16x4xbf16>
    %c0_18 = arith.constant 0 : index
    %c0_19 = arith.constant 0 : index
    %c1_20 = arith.constant 1 : index
    %c0_21 = arith.constant 0 : index
    %15 = vector.load %arg3[%c0_18, %c0_19, %c1_20, %c0_21] : memref<1x3x9x4xbf16, #tpu.memory_space<vmem>>, vector<1x2x8x4xbf16>
    %16 = vector.shape_cast %15 : vector<1x2x8x4xbf16> to vector<2x8x4xbf16>
    %17 = vector.shape_cast %16 : vector<2x8x4xbf16> to vector<16x4xbf16>
    %c0_22 = arith.constant 0 : index
    %c1_23 = arith.constant 1 : index
    %c0_24 = arith.constant 0 : index
    %c0_25 = arith.constant 0 : index
    %18 = vector.load %arg1[%c0_22, %c1_23, %c0_24, %c0_25] : memref<1x3x9x4xbf16, #tpu.memory_space<vmem>>, vector<1x2x8x4xbf16>
    %19 = vector.shape_cast %18 : vector<1x2x8x4xbf16> to vector<2x8x4xbf16>
    %20 = vector.shape_cast %19 : vector<2x8x4xbf16> to vector<16x4xbf16>
    %c0_26 = arith.constant 0 : index
    %c1_27 = arith.constant 1 : index
    %c0_28 = arith.constant 0 : index
    %c0_29 = arith.constant 0 : index
    %21 = vector.load %arg2[%c0_26, %c1_27, %c0_28, %c0_29] : memref<1x3x9x4xbf16, #tpu.memory_space<vmem>>, vector<1x2x8x4xbf16>
    %22 = vector.shape_cast %21 : vector<1x2x8x4xbf16> to vector<2x8x4xbf16>
    %23 = vector.shape_cast %22 : vector<2x8x4xbf16> to vector<16x4xbf16>
    %c0_30 = arith.constant 0 : index
    %c1_31 = arith.constant 1 : index
    %c1_32 = arith.constant 1 : index
    %c0_33 = arith.constant 0 : index
    %24 = vector.load %arg1[%c0_30, %c1_31, %c1_32, %c0_33] : memref<1x3x9x4xbf16, #tpu.memory_space<vmem>>, vector<1x2x8x4xbf16>
    %25 = vector.shape_cast %24 : vector<1x2x8x4xbf16> to vector<2x8x4xbf16>
    %26 = vector.shape_cast %25 : vector<2x8x4xbf16> to vector<16x4xbf16>
    %27 = tpu.concatenate %2, %5, %8, %11, %14, %17, %20, %23, %26 in 1 : vector<16x4xbf16>, vector<16x4xbf16>, vector<16x4xbf16>, vector<16x4xbf16>, vector<16x4xbf16>, vector<16x4xbf16>, vector<16x4xbf16>, vector<16x4xbf16>, vector<16x4xbf16> -> vector<16x36xbf16>
    %c0_34 = arith.constant 0 : index
    %c0_35 = arith.constant 0 : index
    %28 = vector.load %arg5[%c0_34, %c0_35] : memref<36x8xbf16, #tpu.memory_space<vmem>>, vector<36x8xbf16>
    %cst = arith.constant dense<0.000000e+00> : vector<16x8xf32>
    %29 = tpu.matmul %27, %28, %cst {dimension_numbers = #tpu.dot_dimension_numbers<[1], [0], [0], [1], [0, 0, 1, 1], [], []>} : vector<16x36xbf16>, vector<36x8xbf16>, vector<16x8xf32> -> vector<16x8xf32>
    %c0_36 = arith.constant 0 : index
    %c0_37 = arith.constant 0 : index
    %30 = vector.load %arg6[%c0_36, %c0_37] : memref<1x8xf32, #tpu.memory_space<vmem>>, vector<1x8xf32>
    %31 = vector.broadcast %30 : vector<1x8xf32> to vector<16x8xf32>
    %32 = arith.addf %29, %31 : vector<16x8xf32>
    %cst_38 = arith.constant 0.000000e+00 : f32
    %33 = vector.broadcast %cst_38 : f32 to vector<16x8xf32>
    %34 = arith.maximumf %32, %33 : vector<16x8xf32>
    %35 = vector.extract_strided_slice %34 {offsets = [0, 4], sizes = [16, 4], strides = [1, 1]} : vector<16x8xf32> to vector<16x4xf32>
    %36 = arith.truncf %35 : vector<16x4xf32> to vector<16x4xbf16>
    %c0_39 = arith.constant 0 : index
    %c0_40 = arith.constant 0 : index
    %37 = vector.load %arg7[%c0_39, %c0_40] : memref<4x8xbf16, #tpu.memory_space<vmem>>, vector<4x8xbf16>
    %cst_41 = arith.constant dense<0.000000e+00> : vector<16x8xf32>
    %38 = tpu.matmul %36, %37, %cst_41 {dimension_numbers = #tpu.dot_dimension_numbers<[1], [0], [0], [1], [0, 0, 1, 1], [], []>} : vector<16x4xbf16>, vector<4x8xbf16>, vector<16x8xf32> -> vector<16x8xf32>
    %c0_42 = arith.constant 0 : index
    %c0_43 = arith.constant 0 : index
    %39 = vector.load %arg8[%c0_42, %c0_43] : memref<1x8xf32, #tpu.memory_space<vmem>>, vector<1x8xf32>
    %40 = vector.broadcast %39 : vector<1x8xf32> to vector<16x8xf32>
    %41 = arith.addf %38, %40 : vector<16x8xf32>
    %cst_44 = arith.constant 0.000000e+00 : f32
    %42 = vector.broadcast %cst_44 : f32 to vector<16x8xf32>
    %43 = arith.maximumf %41, %42 : vector<16x8xf32>
    %44 = vector.extract_strided_slice %34 {offsets = [0, 0], sizes = [16, 4], strides = [1, 1]} : vector<16x8xf32> to vector<16x4xf32>
    %45 = tpu.concatenate %44, %43 in 1 : vector<16x4xf32>, vector<16x8xf32> -> vector<16x12xf32>
    %46 = arith.truncf %45 : vector<16x12xf32> to vector<16x12xbf16>
    %c0_45 = arith.constant 0 : index
    %c0_46 = arith.constant 0 : index
    %c0_47 = arith.constant 0 : index
    %47 = vector.load %arg9[%c0_45, %c0_46, %c0_47] : memref<1x16x12xbf16, #tpu.memory_space<vmem>>, vector<1x16x12xbf16>
    %48 = vector.shape_cast %47 : vector<1x16x12xbf16> to vector<16x12xbf16>
    %49 = vector.shape_cast %46 : vector<16x12xbf16> to vector<1x16x12xbf16>
    tpu.vector_store %arg9[%c0_45, %c0_46, %c0_47], %49 {strides = array<i32>} : memref<1x16x12xbf16, #tpu.memory_space<vmem>>, vector<1x16x12xbf16>,
    return
  }
  func.func @transform_0(%arg0: i32) -> (i32, i32, i32, i32) {
    %c0_i32 = arith.constant 0 : i32
    %c0_i32_0 = arith.constant 0 : i32
    %c0_i32_1 = arith.constant 0 : i32
    %c0_i32_2 = arith.constant 0 : i32
    return %arg0, %c0_i32, %c0_i32_0, %c0_i32_1 : i32, i32, i32, i32
  }
  func.func @transform_1(%arg0: i32) -> (i32, i32, i32, i32) {
    %c0_i32 = arith.constant 0 : i32
    %c0_i32_0 = arith.constant 0 : i32
    %c0_i32_1 = arith.constant 0 : i32
    %c0_i32_2 = arith.constant 0 : i32
    return %arg0, %c0_i32, %c0_i32_0, %c0_i32_1 : i32, i32, i32, i32
  }
  func.func @transform_2(%arg0: i32) -> (i32, i32, i32, i32) {
    %c0_i32 = arith.constant 0 : i32
    %c0_i32_0 = arith.constant 0 : i32
    %c0_i32_1 = arith.constant 0 : i32
    %c0_i32_2 = arith.constant 0 : i32
    return %arg0, %c0_i32, %c0_i32_0, %c0_i32_1 : i32, i32, i32, i32
  }
  func.func @transform_3(%arg0: i32) -> (i32, i32, i32, i32) {
    %c0_i32 = arith.constant 0 : i32
    %c0_i32_0 = arith.constant 0 : i32
    %c0_i32_1 = arith.constant 0 : i32
    %c0_i32_2 = arith.constant 0 : i32
    return %arg0, %c0_i32, %c0_i32_0, %c0_i32_1 : i32, i32, i32, i32
  }
  func.func @transform_4(%arg0: i32) -> (i32, i32) {
    %c0_i32 = arith.constant 0 : i32
    %c0_i32_0 = arith.constant 0 : i32
    %c0_i32_1 = arith.constant 0 : i32
    return %c0_i32, %c0_i32_0 : i32, i32
  }
  func.func @transform_5(%arg0: i32) -> (i32, i32) {
    %c0_i32 = arith.constant 0 : i32
    %c0_i32_0 = arith.constant 0 : i32
    %c0_i32_1 = arith.constant 0 : i32
    return %c0_i32, %c0_i32_0 : i32, i32
  }
  func.func @transform_6(%arg0: i32) -> (i32, i32) {
    %c0_i32 = arith.constant 0 : i32
    %c0_i32_0 = arith.constant 0 : i32
    %c0_i32_1 = arith.constant 0 : i32
    return %c0_i32, %c0_i32_0 : i32, i32
  }
  func.func @transform_7(%arg0: i32) -> (i32, i32) {
    %c0_i32 = arith.constant 0 : i32
    %c0_i32_0 = arith.constant 0 : i32
    %c0_i32_1 = arith.constant 0 : i32
    return %c0_i32, %c0_i32_0 : i32, i32
  }
  func.func @transform_8(%arg0: i32) -> (i32, i32, i32) {
    %c0_i32 = arith.constant 0 : i32
    %c0_i32_0 = arith.constant 0 : i32
    %c0_i32_1 = arith.constant 0 : i32
    return %arg0, %c0_i32, %c0_i32_0 : i32, i32, i32
  }
}

module attributes {stable_mosaic.version = 11 : i64} {
  func.func @_branches_kernel(%arg0: i32, %arg1: memref<1x2x5x12xbf16, #tpu.memory_space<vmem>>, %arg2: memref<1x2x5x12xbf16, #tpu.memory_space<vmem>>, %arg3: memref<1x2x5x12xbf16, #tpu.memory_space<vmem>>, %arg4: memref<1x2x5x12xbf16, #tpu.memory_space<vmem>>, %arg5: memref<9x1x12xf32, #tpu.memory_space<vmem>>, %arg6: memref<1x12xf32, #tpu.memory_space<vmem>>, %arg7: memref<12x16xbf16, #tpu.memory_space<vmem>>, %arg8: memref<1x16xf32, #tpu.memory_space<vmem>>, %arg9: memref<1x4x16xf32, #tpu.memory_space<vmem>>) attributes {dimension_semantics = [#tpu.dimension_semantics<parallel>], iteration_bounds = array<i64: 8>, scalar_prefetch = 0 : i64, scratch_operands = 0 : i64, tpu.core_type = #tpu.core_type<tc>, window_params = [{transform_indices = @transform_0, window_bounds = array<i64: 1, 2, 5, 12>}, {transform_indices = @transform_1, window_bounds = array<i64: 1, 2, 5, 12>}, {transform_indices = @transform_2, window_bounds = array<i64: 1, 2, 5, 12>}, {transform_indices = @transform_3, window_bounds = array<i64: 1, 2, 5, 12>}, {pipeline_mode = #tpu.pipeline_mode<synchronous>, transform_indices = @transform_4, window_bounds = array<i64: 9, 1, 12>}, {pipeline_mode = #tpu.pipeline_mode<synchronous>, transform_indices = @transform_5, window_bounds = array<i64: 1, 12>}, {pipeline_mode = #tpu.pipeline_mode<synchronous>, transform_indices = @transform_6, window_bounds = array<i64: 12, 16>}, {pipeline_mode = #tpu.pipeline_mode<synchronous>, transform_indices = @transform_7, window_bounds = array<i64: 1, 16>}, {transform_indices = @transform_8, window_bounds = array<i64: 1, 4, 16>}]} {
    %cst = arith.constant 0.000000e+00 : f32
    %0 = vector.broadcast %cst : f32 to vector<4x12xf32>
    %c0 = arith.constant 0 : index
    %c0_0 = arith.constant 0 : index
    %c0_1 = arith.constant 0 : index
    %c0_2 = arith.constant 0 : index
    %1 = vector.load %arg1[%c0, %c0_0, %c0_1, %c0_2] : memref<1x2x5x12xbf16, #tpu.memory_space<vmem>>, vector<1x1x4x12xbf16>
    %2 = vector.shape_cast %1 : vector<1x1x4x12xbf16> to vector<1x4x12xbf16>
    %3 = arith.extf %2 : vector<1x4x12xbf16> to vector<1x4x12xf32>
    %4 = vector.shape_cast %3 : vector<1x4x12xf32> to vector<4x12xf32>
    %c0_3 = arith.constant 0 : index
    %c0_4 = arith.constant 0 : index
    %c0_5 = arith.constant 0 : index
    %5 = vector.load %arg5[%c0_3, %c0_4, %c0_5] : memref<9x1x12xf32, #tpu.memory_space<vmem>>, vector<1x1x12xf32>
    %6 = vector.shape_cast %5 : vector<1x1x12xf32> to vector<1x12xf32>
    %7 = vector.broadcast %6 : vector<1x12xf32> to vector<4x12xf32>
    %8 = arith.mulf %4, %7 : vector<4x12xf32>
    %9 = arith.addf %0, %8 : vector<4x12xf32>
    %c0_6 = arith.constant 0 : index
    %c0_7 = arith.constant 0 : index
    %c0_8 = arith.constant 0 : index
    %c0_9 = arith.constant 0 : index
    %10 = vector.load %arg2[%c0_6, %c0_7, %c0_8, %c0_9] : memref<1x2x5x12xbf16, #tpu.memory_space<vmem>>, vector<1x1x4x12xbf16>
    %11 = vector.shape_cast %10 : vector<1x1x4x12xbf16> to vector<1x4x12xbf16>
    %12 = arith.extf %11 : vector<1x4x12xbf16> to vector<1x4x12xf32>
    %13 = vector.shape_cast %12 : vector<1x4x12xf32> to vector<4x12xf32>
    %c1 = arith.constant 1 : index
    %c0_10 = arith.constant 0 : index
    %c0_11 = arith.constant 0 : index
    %14 = vector.load %arg5[%c1, %c0_10, %c0_11] : memref<9x1x12xf32, #tpu.memory_space<vmem>>, vector<1x1x12xf32>
    %15 = vector.shape_cast %14 : vector<1x1x12xf32> to vector<1x12xf32>
    %16 = vector.broadcast %15 : vector<1x12xf32> to vector<4x12xf32>
    %17 = arith.mulf %13, %16 : vector<4x12xf32>
    %18 = arith.addf %9, %17 : vector<4x12xf32>
    %c0_12 = arith.constant 0 : index
    %c0_13 = arith.constant 0 : index
    %c1_14 = arith.constant 1 : index
    %c0_15 = arith.constant 0 : index
    %19 = vector.load %arg1[%c0_12, %c0_13, %c1_14, %c0_15] : memref<1x2x5x12xbf16, #tpu.memory_space<vmem>>, vector<1x1x4x12xbf16>
    %20 = vector.shape_cast %19 : vector<1x1x4x12xbf16> to vector<1x4x12xbf16>
    %21 = arith.extf %20 : vector<1x4x12xbf16> to vector<1x4x12xf32>
    %22 = vector.shape_cast %21 : vector<1x4x12xf32> to vector<4x12xf32>
    %c2 = arith.constant 2 : index
    %c0_16 = arith.constant 0 : index
    %c0_17 = arith.constant 0 : index
    %23 = vector.load %arg5[%c2, %c0_16, %c0_17] : memref<9x1x12xf32, #tpu.memory_space<vmem>>, vector<1x1x12xf32>
    %24 = vector.shape_cast %23 : vector<1x1x12xf32> to vector<1x12xf32>
    %25 = vector.broadcast %24 : vector<1x12xf32> to vector<4x12xf32>
    %26 = arith.mulf %22, %25 : vector<4x12xf32>
    %27 = arith.addf %18, %26 : vector<4x12xf32>
    %c0_18 = arith.constant 0 : index
    %c0_19 = arith.constant 0 : index
    %c0_20 = arith.constant 0 : index
    %c0_21 = arith.constant 0 : index
    %28 = vector.load %arg3[%c0_18, %c0_19, %c0_20, %c0_21] : memref<1x2x5x12xbf16, #tpu.memory_space<vmem>>, vector<1x1x4x12xbf16>
    %29 = vector.shape_cast %28 : vector<1x1x4x12xbf16> to vector<1x4x12xbf16>
    %30 = arith.extf %29 : vector<1x4x12xbf16> to vector<1x4x12xf32>
    %31 = vector.shape_cast %30 : vector<1x4x12xf32> to vector<4x12xf32>
    %c3 = arith.constant 3 : index
    %c0_22 = arith.constant 0 : index
    %c0_23 = arith.constant 0 : index
    %32 = vector.load %arg5[%c3, %c0_22, %c0_23] : memref<9x1x12xf32, #tpu.memory_space<vmem>>, vector<1x1x12xf32>
    %33 = vector.shape_cast %32 : vector<1x1x12xf32> to vector<1x12xf32>
    %34 = vector.broadcast %33 : vector<1x12xf32> to vector<4x12xf32>
    %35 = arith.mulf %31, %34 : vector<4x12xf32>
    %36 = arith.addf %27, %35 : vector<4x12xf32>
    %c0_24 = arith.constant 0 : index
    %c0_25 = arith.constant 0 : index
    %c0_26 = arith.constant 0 : index
    %c0_27 = arith.constant 0 : index
    %37 = vector.load %arg4[%c0_24, %c0_25, %c0_26, %c0_27] : memref<1x2x5x12xbf16, #tpu.memory_space<vmem>>, vector<1x1x4x12xbf16>
    %38 = vector.shape_cast %37 : vector<1x1x4x12xbf16> to vector<1x4x12xbf16>
    %39 = arith.extf %38 : vector<1x4x12xbf16> to vector<1x4x12xf32>
    %40 = vector.shape_cast %39 : vector<1x4x12xf32> to vector<4x12xf32>
    %c4 = arith.constant 4 : index
    %c0_28 = arith.constant 0 : index
    %c0_29 = arith.constant 0 : index
    %41 = vector.load %arg5[%c4, %c0_28, %c0_29] : memref<9x1x12xf32, #tpu.memory_space<vmem>>, vector<1x1x12xf32>
    %42 = vector.shape_cast %41 : vector<1x1x12xf32> to vector<1x12xf32>
    %43 = vector.broadcast %42 : vector<1x12xf32> to vector<4x12xf32>
    %44 = arith.mulf %40, %43 : vector<4x12xf32>
    %45 = arith.addf %36, %44 : vector<4x12xf32>
    %c0_30 = arith.constant 0 : index
    %c0_31 = arith.constant 0 : index
    %c1_32 = arith.constant 1 : index
    %c0_33 = arith.constant 0 : index
    %46 = vector.load %arg3[%c0_30, %c0_31, %c1_32, %c0_33] : memref<1x2x5x12xbf16, #tpu.memory_space<vmem>>, vector<1x1x4x12xbf16>
    %47 = vector.shape_cast %46 : vector<1x1x4x12xbf16> to vector<1x4x12xbf16>
    %48 = arith.extf %47 : vector<1x4x12xbf16> to vector<1x4x12xf32>
    %49 = vector.shape_cast %48 : vector<1x4x12xf32> to vector<4x12xf32>
    %c5 = arith.constant 5 : index
    %c0_34 = arith.constant 0 : index
    %c0_35 = arith.constant 0 : index
    %50 = vector.load %arg5[%c5, %c0_34, %c0_35] : memref<9x1x12xf32, #tpu.memory_space<vmem>>, vector<1x1x12xf32>
    %51 = vector.shape_cast %50 : vector<1x1x12xf32> to vector<1x12xf32>
    %52 = vector.broadcast %51 : vector<1x12xf32> to vector<4x12xf32>
    %53 = arith.mulf %49, %52 : vector<4x12xf32>
    %54 = arith.addf %45, %53 : vector<4x12xf32>
    %c0_36 = arith.constant 0 : index
    %c1_37 = arith.constant 1 : index
    %c0_38 = arith.constant 0 : index
    %c0_39 = arith.constant 0 : index
    %55 = vector.load %arg1[%c0_36, %c1_37, %c0_38, %c0_39] : memref<1x2x5x12xbf16, #tpu.memory_space<vmem>>, vector<1x1x4x12xbf16>
    %56 = vector.shape_cast %55 : vector<1x1x4x12xbf16> to vector<1x4x12xbf16>
    %57 = arith.extf %56 : vector<1x4x12xbf16> to vector<1x4x12xf32>
    %58 = vector.shape_cast %57 : vector<1x4x12xf32> to vector<4x12xf32>
    %c6 = arith.constant 6 : index
    %c0_40 = arith.constant 0 : index
    %c0_41 = arith.constant 0 : index
    %59 = vector.load %arg5[%c6, %c0_40, %c0_41] : memref<9x1x12xf32, #tpu.memory_space<vmem>>, vector<1x1x12xf32>
    %60 = vector.shape_cast %59 : vector<1x1x12xf32> to vector<1x12xf32>
    %61 = vector.broadcast %60 : vector<1x12xf32> to vector<4x12xf32>
    %62 = arith.mulf %58, %61 : vector<4x12xf32>
    %63 = arith.addf %54, %62 : vector<4x12xf32>
    %c0_42 = arith.constant 0 : index
    %c1_43 = arith.constant 1 : index
    %c0_44 = arith.constant 0 : index
    %c0_45 = arith.constant 0 : index
    %64 = vector.load %arg2[%c0_42, %c1_43, %c0_44, %c0_45] : memref<1x2x5x12xbf16, #tpu.memory_space<vmem>>, vector<1x1x4x12xbf16>
    %65 = vector.shape_cast %64 : vector<1x1x4x12xbf16> to vector<1x4x12xbf16>
    %66 = arith.extf %65 : vector<1x4x12xbf16> to vector<1x4x12xf32>
    %67 = vector.shape_cast %66 : vector<1x4x12xf32> to vector<4x12xf32>
    %c7 = arith.constant 7 : index
    %c0_46 = arith.constant 0 : index
    %c0_47 = arith.constant 0 : index
    %68 = vector.load %arg5[%c7, %c0_46, %c0_47] : memref<9x1x12xf32, #tpu.memory_space<vmem>>, vector<1x1x12xf32>
    %69 = vector.shape_cast %68 : vector<1x1x12xf32> to vector<1x12xf32>
    %70 = vector.broadcast %69 : vector<1x12xf32> to vector<4x12xf32>
    %71 = arith.mulf %67, %70 : vector<4x12xf32>
    %72 = arith.addf %63, %71 : vector<4x12xf32>
    %c0_48 = arith.constant 0 : index
    %c1_49 = arith.constant 1 : index
    %c1_50 = arith.constant 1 : index
    %c0_51 = arith.constant 0 : index
    %73 = vector.load %arg1[%c0_48, %c1_49, %c1_50, %c0_51] : memref<1x2x5x12xbf16, #tpu.memory_space<vmem>>, vector<1x1x4x12xbf16>
    %74 = vector.shape_cast %73 : vector<1x1x4x12xbf16> to vector<1x4x12xbf16>
    %75 = arith.extf %74 : vector<1x4x12xbf16> to vector<1x4x12xf32>
    %76 = vector.shape_cast %75 : vector<1x4x12xf32> to vector<4x12xf32>
    %c8 = arith.constant 8 : index
    %c0_52 = arith.constant 0 : index
    %c0_53 = arith.constant 0 : index
    %77 = vector.load %arg5[%c8, %c0_52, %c0_53] : memref<9x1x12xf32, #tpu.memory_space<vmem>>, vector<1x1x12xf32>
    %78 = vector.shape_cast %77 : vector<1x1x12xf32> to vector<1x12xf32>
    %79 = vector.broadcast %78 : vector<1x12xf32> to vector<4x12xf32>
    %80 = arith.mulf %76, %79 : vector<4x12xf32>
    %81 = arith.addf %72, %80 : vector<4x12xf32>
    %c0_54 = arith.constant 0 : index
    %c0_55 = arith.constant 0 : index
    %82 = vector.load %arg6[%c0_54, %c0_55] : memref<1x12xf32, #tpu.memory_space<vmem>>, vector<1x12xf32>
    %83 = vector.broadcast %82 : vector<1x12xf32> to vector<4x12xf32>
    %84 = arith.addf %81, %83 : vector<4x12xf32>
    %85 = arith.truncf %84 : vector<4x12xf32> to vector<4x12xbf16>
    %c0_56 = arith.constant 0 : index
    %c0_57 = arith.constant 0 : index
    %86 = vector.load %arg7[%c0_56, %c0_57] : memref<12x16xbf16, #tpu.memory_space<vmem>>, vector<12x16xbf16>
    %cst_58 = arith.constant dense<0.000000e+00> : vector<4x16xf32>
    %87 = tpu.matmul %85, %86, %cst_58 {dimension_numbers = #tpu.dot_dimension_numbers<[1], [0], [0], [1], [0, 0, 1, 1], [], []>} : vector<4x12xbf16>, vector<12x16xbf16>, vector<4x16xf32> -> vector<4x16xf32>
    %c0_59 = arith.constant 0 : index
    %c0_60 = arith.constant 0 : index
    %88 = vector.load %arg8[%c0_59, %c0_60] : memref<1x16xf32, #tpu.memory_space<vmem>>, vector<1x16xf32>
    %89 = vector.broadcast %88 : vector<1x16xf32> to vector<4x16xf32>
    %90 = arith.addf %87, %89 : vector<4x16xf32>
    %cst_61 = arith.constant 0.000000e+00 : f32
    %91 = vector.broadcast %cst_61 : f32 to vector<4x16xf32>
    %92 = arith.maximumf %90, %91 : vector<4x16xf32>
    %c0_62 = arith.constant 0 : index
    %c0_63 = arith.constant 0 : index
    %c0_64 = arith.constant 0 : index
    %93 = vector.load %arg9[%c0_62, %c0_63, %c0_64] : memref<1x4x16xf32, #tpu.memory_space<vmem>>, vector<1x4x16xf32>
    %94 = vector.shape_cast %93 : vector<1x4x16xf32> to vector<4x16xf32>
    %95 = vector.shape_cast %92 : vector<4x16xf32> to vector<1x4x16xf32>
    tpu.vector_store %arg9[%c0_62, %c0_63, %c0_64], %95 {strides = array<i32>} : memref<1x4x16xf32, #tpu.memory_space<vmem>>, vector<1x4x16xf32>,
    return
  }
  func.func @transform_0(%arg0: i32) -> (i32, i32, i32, i32) {
    %c0_i32 = arith.constant 0 : i32
    %c0_i32_0 = arith.constant 0 : i32
    %c0_i32_1 = arith.constant 0 : i32
    %c0_i32_2 = arith.constant 0 : i32
    return %arg0, %c0_i32, %c0_i32_0, %c0_i32_1 : i32, i32, i32, i32
  }
  func.func @transform_1(%arg0: i32) -> (i32, i32, i32, i32) {
    %c0_i32 = arith.constant 0 : i32
    %c0_i32_0 = arith.constant 0 : i32
    %c0_i32_1 = arith.constant 0 : i32
    %c0_i32_2 = arith.constant 0 : i32
    return %arg0, %c0_i32, %c0_i32_0, %c0_i32_1 : i32, i32, i32, i32
  }
  func.func @transform_2(%arg0: i32) -> (i32, i32, i32, i32) {
    %c0_i32 = arith.constant 0 : i32
    %c0_i32_0 = arith.constant 0 : i32
    %c0_i32_1 = arith.constant 0 : i32
    %c0_i32_2 = arith.constant 0 : i32
    return %arg0, %c0_i32, %c0_i32_0, %c0_i32_1 : i32, i32, i32, i32
  }
  func.func @transform_3(%arg0: i32) -> (i32, i32, i32, i32) {
    %c0_i32 = arith.constant 0 : i32
    %c0_i32_0 = arith.constant 0 : i32
    %c0_i32_1 = arith.constant 0 : i32
    %c0_i32_2 = arith.constant 0 : i32
    return %arg0, %c0_i32, %c0_i32_0, %c0_i32_1 : i32, i32, i32, i32
  }
  func.func @transform_4(%arg0: i32) -> (i32, i32, i32) {
    %c0_i32 = arith.constant 0 : i32
    %c0_i32_0 = arith.constant 0 : i32
    %c0_i32_1 = arith.constant 0 : i32
    %c0_i32_2 = arith.constant 0 : i32
    return %c0_i32, %c0_i32_0, %c0_i32_1 : i32, i32, i32
  }
  func.func @transform_5(%arg0: i32) -> (i32, i32) {
    %c0_i32 = arith.constant 0 : i32
    %c0_i32_0 = arith.constant 0 : i32
    %c0_i32_1 = arith.constant 0 : i32
    return %c0_i32, %c0_i32_0 : i32, i32
  }
  func.func @transform_6(%arg0: i32) -> (i32, i32) {
    %c0_i32 = arith.constant 0 : i32
    %c0_i32_0 = arith.constant 0 : i32
    %c0_i32_1 = arith.constant 0 : i32
    return %c0_i32, %c0_i32_0 : i32, i32
  }
  func.func @transform_7(%arg0: i32) -> (i32, i32) {
    %c0_i32 = arith.constant 0 : i32
    %c0_i32_0 = arith.constant 0 : i32
    %c0_i32_1 = arith.constant 0 : i32
    return %c0_i32, %c0_i32_0 : i32, i32
  }
  func.func @transform_8(%arg0: i32) -> (i32, i32, i32) {
    %c0_i32 = arith.constant 0 : i32
    %c0_i32_0 = arith.constant 0 : i32
    %c0_i32_1 = arith.constant 0 : i32
    return %arg0, %c0_i32, %c0_i32_0 : i32, i32, i32
  }
}

</mosaic_0001>

<bundles_post_ra>
// kernel: stem_forward.2
= control target key start
LH: loop header
LB: loop body
LE: loop exit
PB: predicated region body
PF: predicated region fallthrough
CT: control target
= control target key end

     0   :  { %s964_s27 = smov 0   ;;  %s1083_s0 = inlined_call_operand.vmem [shape: bf16[8,3,9,4], index: 0, kind: input, shape index: {}]   ;;  %s1084_s1 = inlined_call_operand.vmem [shape: bf16[8,3,9,4], index: 1, kind: input, shape index: {}]   ;;  %s1085_s2 = inlined_call_operand.vmem [shape: bf16[8,3,9,4], index: 2, kind: input, shape index: {}]   ;;  %s1086_s3 = inlined_call_operand.vmem [shape: bf16[8,3,9,4], index: 3, kind: input, shape index: {}]   ;;  %s1087_s4 = inlined_call_operand.vmem [shape: bf16[36,8], index: 4, kind: input, shape index: {}]   ;;  %s1088_s5 = inlined_call_operand.vmem [shape: f32[1,8], index: 5, kind: input, shape index: {}]   ;;  %s1089_s6 = inlined_call_operand.vmem [shape: bf16[4,8], index: 6, kind: input, shape index: {}]   ;;  %s1090_s7 = inlined_call_operand.vmem [shape: f32[1,8], index: 7, kind: input, shape index: {}]   ;;  %s1091_s8 = inlined_call_operand.vmem [shape: bf16[8,16,12], index: 8, kind: output, shape index: {}]  }
   0x1 LB: > { %s804_s28 = sadd.s32 4294967295, %s906_s27   ;;  %p808_p0 = scmp.ge.s32.totalorder %s906_s27, 1  ;;  %s906_s27 = sphi %s964_s27, %s18_s27  }
   0x2   : > { %p292_p1 = scmp.lt.s32.totalorder %s906_s27, 9 }
   0x4   : > { %p293_p2 = pnand %p808_p0, %p292_p1 }
   0x5   : > { %p341_p3 = scmp.lt.s32.totalorder (!%p293_p2), %s804_s28, 7  ;;  %v908_v0 = vmov (!%p293_p2), 0.0   ;;  %v897_v1 = vld [vmem:[%s1087_s4] sm:$0xff] (!%p293_p2)   ;;  %vm373_vm0 = vsmask.f32 (!%p293_p2), 3328  ;;  %s909_s19 = smov (!%p293_p2), 4  }
   0x6   : > { %296 = sbr.rel (%p293_p2) target bundleno = 835 (0x343), region = 52  ;;  %850 = vmatprep.subr.bf16.mxu0 (!%p293_p2), %v908_v0  ;;  %860 = vmatprep.subr.bf16.mxu1 (!%p293_p2), %v908_v0  ;;  %vm374_vm1 = vsmask.f32 (!%p293_p2), 7440  ;;  %s910_s23 = smov (!%p293_p2), 12   ;;  %v898_v29 = vld [vmem:[%s1087_s4 + $0x8] sm:$0xff] (!%p293_p2)   ;;  %vm584_vm3 = vcmask (!%p293_p2), 1041408  }
   0x7   : > { %851 = vmatpush3.bf16.msra.mxu0 (!%p293_p2), %v897_v1  ;;  %s911_s26 = smov (!%p293_p2), 16   ;;  %vm1031_vm2 = vmor (!%p293_p2), %vm373_vm0, %vm374_vm1  ;;  %s912_s29 = smov (!%p293_p2), 24   ;;  %vm914_vm4 = vmmov (!%p293_p2), 0   ;;  %vm529_vm5 = vcmask (!%p293_p2), 31744   ;;  %vm533_vm6 = vcmask (!%p293_p2), 64512   ;;  %vm536_vm7 = vcmask (!%p293_p2), 97280  }
   0x8   : > { %852 = vmatprep.subr.bf16.mxu0 (!%p293_p2), %v908_v0  ;;  %s913_s10 = smov (!%p293_p2), 8   ;;  %856 = vmatprep.mubr.msk.bf16.mxu0 (!%p293_p2), %vm914_vm4, %v908_v0  ;;  %s915_s11 = smov (!%p293_p2), 20   ;;  %vm539_vm8 = vcmask (!%p293_p2), 130048   ;;  %vm542_vm9 = vcmask (!%p293_p2), 162816   ;;  %vm545_vm10 = vcmask (!%p293_p2), 195584   ;;  %vm548_vm11 = vcmask (!%p293_p2), 228352  }
   0x9   : > { %862 = vmatprep.mubr.msk.bf16.mxu1 (!%p293_p2), %vm914_vm4, %v908_v0  ;;  %s916_s13 = smov (!%p293_p2), 32   ;;  %s917_s14 = smov (!%p293_p2), 28   ;;  %vm551_vm12 = vcmask (!%p293_p2), 261120   ;;  %vm581_vm13 = vcmask (!%p293_p2), 293888   ;;  %vm710_vm14 = vcmask (!%p293_p2), 93184  }
   0xb   : > { %853 = vmatpush3.bf16.msra.mxu0 (!%p293_p2), %v898_v29 }
   0xc   : > { %854 = vmatprep.subr.bf16.mxu0 (!%p293_p2), %v908_v0 }
   0xd   : > { %s1095_s28 = smov (!%p341_p3, %s804_s28), 7 }
   0xe   : > { %s980_s9 = smul.u32 24, %s1095_s28 }
  0x10   : > { %s987_s12 = scalar_lea.vmem %s1084_s1, %s980_s9  ;;  %s993_s15 = scalar_lea.vmem %s1083_s0, %s980_s9 }
  0x11   : > { %v891_v2 = vld [vmem:[%s987_s12] ss:$8 sps:$4 sm:$0xff]   ;;  %s1000_s18 = scalar_lea.vmem %s1085_s2, %s980_s9  ;;  %v371_v12 = vld [vmem:[%s993_s15 + $0x4] sm:$0x1]  ;;  %v372_v13 = vld [vmem:[%s993_s15 + $0xc] sm:$0x1]  ;;  %s360_s22 = scalar_lea.vmem %s1086_s3, %s980_s9 }
  0x12   : > { %v404_v3 = vld [vmem:[%s1000_s18] sm:$0xf]  ;;  %v405_v4 = vld [vmem:[%s1000_s18 + $0x8] sm:$0xf]  ;;  %484 = vrot.lane.b32.xlu0 %v891_v2, %s909_s19  ;;  %v386_v22 = vshll.u32 %v371_v12, 16  ;;  %v400_v27 = vshll.u32 %v372_v13, 16 }
  0x13   : > { %v1005_v5 = vld [vmem:[%s993_s15] sm:$0xf]  ;;  %v425_v6 = vshrl.u32 %v405_v4, 16  ;;  %v428_v7 = vshll.u32 %v405_v4, 16  ;;  %v824_v8 = vcombine.low %v404_v3, %v405_v4  ;;  %v411_v9 = vshrl.u32 %v404_v3, 16 }
  0x14   : > { %v1009_v10 = vld [vmem:[%s993_s15 + $0x8] sm:$0xf]  ;;  %v414_v11 = vshll.u32 %v404_v3, 16  ;;  %v377_v14 = vshrl.u32 %v1005_v5, 16  ;;  %v380_v19 = vshll.u32 %v1005_v5, 16  ;;  %v388_v31 = vrot.slane %v386_v22, 5 }
  0x15   : > { %v821_v15 = vcombine.low %v1005_v5, %v1009_v10  ;;  %v427_v16 = vrot.slane %v425_v6, 4  ;;  %v430_v17 = vrot.slane %v428_v7, 5  ;;  %496 = vrot.lane.b32.xlu1 %v824_v8, %s910_s23  ;;  %v413_v18 = vrot.slane %v411_v9, 4  ;;  %v893_v28 = vld [vmem:[%s360_s22] ss:$8 sps:$4 sm:$0xff]   ;;  %s841_s22 = sshll.u32 %s1095_s28, 3 }
  0x16   : > { %v416_v20 = vrot.slane %v414_v11, 5  ;;  %v379_v21 = vrot.slane %v377_v14, 4  ;;  %v391_v23 = vshrl.u32 %v1009_v10, 16  ;;  %v382_v25 = vrot.slane %v380_v19, 5  ;;  %v408_v33 = vld [vmem:[%s1000_s18 + $0x4] sm:$0x1]  ;;  %s365_s25 = scalar_lea.vmem %s1091_s8, %s841_s22 }
  0x17   : > { %v431_v24 = vor.u32 %v430_v17, %v427_v16  ;;  %v394_v26 = vshll.u32 %v1009_v10, 16  ;;  %v409_v34 = vld [vmem:[%s1000_s18 + $0xc] sm:$0x1]  ;;  %v402_v38 = vrot.slane %v400_v27, 5  ;;  %v815_v39 = vld [vmem:[%s993_s15 + $0x8] sm:$0xf] }
  0x18   : > { %v417_v30 = vor.u32 %v416_v20, %v413_v18  ;;  %v393_v32 = vrot.slane %v391_v23, 4  ;;  %v383_v36 = vor.u32 %v382_v25, %v379_v21  ;;  %v420_v42 = vshll.u32 %v408_v33, 16  ;;  %v816_v44 = vld [vmem:[%s993_s15 + $0x10] sm:$0xf]  ;;  %v819_v61 = vld [vmem:[%s993_s15 + $0xc] sm:$0x1] }
  0x19   : > { %v432_v35 = vrot.slane %v431_v24, 4  ;;  %v396_v37 = vrot.slane %v394_v26, 5  ;;  %503 = vrot.lane.b32.xlu1 %v893_v28, %s911_s26  ;;  %v434_v43 = vshll.u32 %v409_v34, 16  ;;  %v447_v45 = vshrl.u32 %v815_v39, 16  ;;  %v820_v62 = vld [vmem:[%s993_s15 + $0x14] sm:$0x1] }
  0x1a   : > { %v418_v40 = vrot.slane %v417_v30, 4  ;;  %v384_v46 = vrot.slane %v383_v36, 4  ;;  %v461_v48 = vshrl.u32 %v816_v44, 16  ;;  %v464_v49 = vshll.u32 %v816_v44, 16  ;;  %v895_v18 = vld [vmem:[%s987_s12 + $0x8] ss:$8 sps:$4 sm:$0xff]  }
  0x1b   : > { %v397_v47 = vor.u32 %v396_v37, %v393_v32  ;;  %v422_v50 = vrot.slane %v420_v42, 5  ;;  %v436_v51 = vrot.slane %v434_v43, 5  ;;  %v827_v52 = vcombine.low %v815_v39, %v816_v44  ;;  %v899_v3 = vld [vmem:[%s1087_s4 + $0x10] ss:$0 sps:$4 sm:$0x33]   ;;  %s918_s18 = smov 124  }
  0x1c   : > { %v389_v53 = vsel %vm1031_vm2, %v384_v46, %v388_v31  ;;  %v463_v55 = vrot.slane %v461_v48, 4  ;;  %v466_v56 = vrot.slane %v464_v49, 5  ;;  %v449_v59 = vrot.slane %v447_v45, 4  ;;  %v632_v10 = vld [vmem:[%s1089_s6] sm:$0x3] }
  0x1d   : > { %v398_v54 = vrot.slane %v397_v47, 4  ;;  %v423_v57 = vsel %vm1031_vm2, %v418_v40, %v422_v50  ;;  %v437_v58 = vsel %vm1031_vm2, %v432_v35, %v436_v51  ;;  %515 = vrot.lane.b32.xlu1 %v827_v52, %s912_s29  ;;  %v450_v60 = vshll.u32 %v815_v39, 16  ;;  %v830_v35 = vld [vmem:[%s1088_s5] ss:$0 sm:$0xff] }
  0x1e   : > { %v456_v1 = vshll.u32 %v819_v61, 16  ;;  %v467_v2 = vor.u32 %v466_v56, %v463_v55  ;;  %v470_v7 = vshll.u32 %v820_v62, 16  ;;  %v826_v8 = vcombine.low %v423_v57, %v437_v58  ;;  %v835_v46 = vld [vmem:[%s1090_s7] ss:$0 sm:$0xff] }
  0x1f   : > { %v403_v63 = vsel %vm1031_vm2, %v398_v54, %v402_v38  ;;  %v452_v6 = vrot.slane %v450_v60, 5  ;;  %v586_v14 = vsel %vm584_vm3, %v899_v3, 0 }
  0x20   : > { %v823_v4 = vcombine.low %v389_v53, %v403_v63  ;;  %v468_v9 = vrot.slane %v467_v2, 4  ;;  %v458_v12 = vrot.slane %v456_v1, 5  ;;  %v472_v13 = vrot.slane %v470_v7, 5  ;;  %855 = vmatpush3.bf16.msra.mxu0 %v586_v14 }
  0x21   : > { %v453_v11 = vor.u32 %v452_v6, %v449_v59 }
  0x22   : > { %489 = vrot.lane.b32.xlu0 %v823_v4, %s913_s10  ;;  %v473_v17 = vsel %vm1031_vm2, %v468_v9, %v472_v13 }
  0x23   : > { %v454_v16 = vrot.slane %v453_v11, 4 }
  0x25   : > { %v459_v19 = vsel %vm1031_vm2, %v454_v16, %v458_v12 }
  0x26   : > { %508 = vrot.lane.b32.xlu0 %v826_v8, %s915_s11  ;;  %v829_v20 = vcombine.low %v459_v19, %v473_v17 }
  0x28   : > { %527 = vrot.lane.b32.xlu1 %v829_v20, %s916_s13 }
  0x2a   : > { %522 = vrot.lane.b32.xlu0 %v895_v18, %s917_s14 }
  0x84   : > { %v485_v22 = vpop.permute.xlu0 %484 }
  0x85   : > { %v532_v0 = vsel %vm529_vm5, %v821_v15, %v485_v22  ;;  %v647_v15 = vsel %vm584_vm3, %v632_v10, 0 }
  0x86   : > { %861 = vmatpush3.bf16.msra.mxu1 %v647_v15 }
  0x87   : > { %v497_v21 = vpop.permute.xlu1 %496 }
  0x8b   : > { %v504_v23 = vpop.permute.xlu1 %503 }
  0x8f   : > { %v516_v26 = vpop.permute.xlu1 %515 }
  0x94   : > { %v490_v24 = vpop.permute.xlu0 %489 }
  0x95   : > { %v535_v25 = vsel %vm533_vm6, %v532_v0, %v490_v24 }
  0x96   : > { %v538_v27 = vsel %vm536_vm7, %v535_v25, %v497_v21 }
  0x97   : > { %v541_v28 = vsel %vm539_vm8, %v538_v27, %v504_v23 }
  0x98   : > { %v509_v29 = vpop.permute.xlu0 %508 }
  0x99   : > { %v544_v30 = vsel %vm542_vm9, %v541_v28, %v509_v29 }
  0x9a   : > { %v528_v31 = vpop.permute.xlu1 %527  ;;  %v547_v32 = vsel %vm545_vm10, %v544_v30, %v516_v26 }
  0x9c   : > { %v523_v33 = vpop.permute.xlu0 %522 }
  0x9d   : > { %v550_v34 = vsel %vm548_vm11, %v547_v32, %v523_v33 }
  0x9e   : > { %v553_v5 = vsel %vm551_vm12, %v550_v34, %v528_v31 }
  0x9f   : > { %857 = vmatmul.mubr.msk.bf16.vlgmr.msra.gmra.mrb[0].mxu0 %vm581_vm13, %v553_v5 }
 0x172   : > { %v622_v36 = vpop.f32.mrb[0].mxu0 }
 0x173   : > { %v623_v37 = vadd.f32 %v830_v35, %v622_v36  ;;  %v858_v38 = vpop.f32.mrb[1].mxu0 }
 0x174   : > { %v625_v39 = vpop.f32.mrb[2].mxu0 }
 0x175   : > { %v626_v40 = vadd.f32 %v830_v35, %v625_v39  ;;  %v859_v41 = vpop.f32.mrb[3].mxu0  ;;  %v629_v42 = vmax.f32 %v623_v37, 0.0 }
 0x177   : > { %v630_v43 = vmax.f32 %v626_v40, 0.0 }
 0x179   : > { %v631_v44 = vpack.c.bf16 %v630_v43, %v629_v42 }
 0x17b   : > { %641 = vrot.lane.b32.xlu0 %v631_v44, %s918_s18 }
 0x1ed   : > { %v642_v45 = vpop.permute.xlu0 %641 }
 0x1ee   : > { %863 = vmatmul.mubr.msk.bf16.vlgmr.msra.gmra.mrb[0].mxu1 %vm529_vm5, %v642_v45 }
 0x2c1   : > { %v683_v47 = vpop.f32.mrb[0].mxu1 }
 0x2c2   : > { %v684_v48 = vadd.f32 %v835_v46, %v683_v47  ;;  %v864_v49 = vpop.f32.mrb[1].mxu1 }
 0x2c3   : > { %v686_v50 = vpop.f32.mrb[2].mxu1 }
 0x2c4   : > { %v687_v51 = vadd.f32 %v835_v46, %v686_v50  ;;  %v865_v52 = vpop.f32.mrb[3].mxu1  ;;  %v690_v53 = vmax.f32 %v684_v48, 0.0 }
 0x2c6   : > { %v691_v54 = vmax.f32 %v687_v51, 0.0 }
 0x2c8   : > { %v886_v55 = vpack.i.bf16 %v691_v54, %v690_v53 }
 0x2ca   : > { %887 = vrot.lane.b32.xlu1 %v886_v55, %s909_s19 }
 0x33c   : > { %v888_v56 = vpop.permute.xlu1 %887 }
 0x33d   : > { %v890_v57 = vunpack.i.h.bf16 %v888_v56  ;;  %v889_v58 = vunpack.i.l.bf16 %v888_v56 }
 0x33f   : > { %v701_v59 = vsel %vm529_vm5, %v630_v43, %v890_v57  ;;  %v700_v60 = vsel %vm529_vm5, %v629_v42, %v889_v58 }
 0x340   : > { %v843_v61 = vpack.c.bf16 %v701_v59, %v701_v59  ;;  %v842_v62 = vpack.c.bf16 %v700_v60, %v700_v60 }
 0x342   : > { %712 = vst.msk [vmem:[%s365_s25 + $0x4] sm:$0xf] %vm710_vm14, %v843_v61  ;;  %711 = vst.msk [vmem:[%s365_s25] sm:$0xf] %vm710_vm14, %v842_v62 }
 0x343 PF: > { %s18_s27 = sadd.s32 1, %s906_s27  }
 0x344   : > { %p15_p4 = scmp.ge.s32.totalorder %s18_s27, 10  }
 0x346   :  { %17 = sbr.rel (!%p15_p4) target bundleno = 1 (0x1), region = 93 }

// kernel: stem_forward.3
= control target key start
LH: loop header
LB: loop body
LE: loop exit
PB: predicated region body
PF: predicated region fallthrough
CT: control target
= control target key end

     0   :  { %s1018_s0 = inlined_call_operand.vmem [shape: bf16[8,2,5,12], index: 0, kind: input, shape index: {}]   ;;  %s1019_s1 = inlined_call_operand.vmem [shape: bf16[8,2,5,12], index: 1, kind: input, shape index: {}]   ;;  %s1020_s2 = inlined_call_operand.vmem [shape: bf16[8,2,5,12], index: 2, kind: input, shape index: {}]   ;;  %s1021_s3 = inlined_call_operand.vmem [shape: bf16[8,2,5,12], index: 3, kind: input, shape index: {}]   ;;  %s1022_s4 = inlined_call_operand.vmem [shape: f32[9,1,12], index: 4, kind: input, shape index: {}]   ;;  %s1023_s5 = inlined_call_operand.vmem [shape: f32[1,12], index: 5, kind: input, shape index: {}]   ;;  %s1024_s6 = inlined_call_operand.vmem [shape: bf16[12,16], index: 6, kind: input, shape index: {}]   ;;  %s1025_s7 = inlined_call_operand.vmem [shape: f32[1,16], index: 7, kind: input, shape index: {}]   ;;  %s1026_s8 = inlined_call_operand.hbm [shape: f32[8,4,16], index: 8, kind: output, shape index: {}]  }
   0x1   :  { %1027 = sst [smem:[#allocation6_spill]] %s1018_s0 }
   0x2   :  { %1028 = sst [smem:[#allocation7_spill]] %s1024_s6 }
   0x3   :  { %13 = vsyncpa [#allocation3], 0 }
   0x4   :  { %15 = vsyncpa [#allocation3 + $0x1], 0  ;;  %s873_s27 = smov 0   ;;  %s875_s28 = smov 0  }
   0x5   :  { %s877_s29 = smov 0   ;;  %s879_s30 = smov 0  }
   0x6 LB: > { %s894_s9 = sadd.s32 4294967295, %s823_s30   ;;  %s666_s10 = sadd.s32 4294967294, %s823_s30   ;;  %s823_s30 = sphi %s879_s30, %s1038_s30   ;;  %s819_s29 = sphi %s877_s29, %s1037_s29   ;;  %s815_s28 = sphi %s875_s28, %s1036_s28   ;;  %s811_s27 = sphi %s873_s27, %s1035_s27  }
   0x7   : > { %s898_s11 = sadd.s32 1, %s823_s30   ;;  %s216_s12 = sadd.s32 1, %s819_s29 }
   0x8   : > { %s213_s13 = ssub.s32 %s823_s30, %s898_s11  ;;  %p226_p0 = scmp.ne.s32.totalorder %s819_s29, %s815_s28 }
   0x9   : > { %p214_p1 = scmp.eq.s32.totalorder %s213_s13, 0  ;;  %p227_p2 = scmp.eq.s32.totalorder %s894_s9, 7 }
   0xa   : > { %p232_p3 = scmp.ne.s32.totalorder %s815_s28, %s811_s27  ;;  %p233_p4 = scmp.eq.s32.totalorder %s666_s10, 7 }
   0xb   : > { %s909_s14 = scalar_select %p214_p1, %s819_s29, %s216_s12  }
   0xc   : > { %p911_p5 = por %p227_p2, %p226_p0  ;;  %p915_p6 = por %p233_p4, %p232_p3 }
   0xd   : > { %1029 = sst [smem:[#allocation5_spill]] %s909_s14  ;;  %p669_p7 = scmp.ge.s32.totalorder %s823_s30, 1 }
   0xe   : > { %p295_p8 = scmp.lt.s32.totalorder %s823_s30, 9 }
  0x10   : > { %p296_p9 = pnand %p669_p7, %p295_p8 }
  0x11   : > { %vm510_vm0 = vcmask (!%p296_p9), 1045504   ;;  %v825_v0 = vmov (!%p296_p9), 0.0   ;;  %s1032_s6 = sld [smem:[#allocation7_spill]] (!%p296_p9)  ;;  %p344_p10 = scmp.lt.s32.totalorder (!%p296_p9), %s894_s9, 7  ;;  %vm826_vm1 = vmmov (!%p296_p9), 0   ;;  %vm506_vm2 = vcmask (!%p296_p9), 97280  }
  0x12   : > { %299 = sbr.rel (%p296_p9) target bundleno = 286 (0x11e), region = 52  ;;  %713 = vmatprep.subr.bf16.mxu0 (!%p296_p9), %v825_v0  ;;  %715 = vmatprep.mubr.msk.bf16.mxu0 (!%p296_p9), %vm826_vm1, %v825_v0  ;;  %s1033_s0 = sld [smem:[#allocation6_spill]] (!%p296_p9)  ;;  %v679_v3 = vld [vmem:[%s1022_s4] ss:$0 sm:$0xff] (!%p296_p9)  ;;  %v681_v4 = vld [vmem:[%s1022_s4 + $0x1] ss:$0 sm:$0xff] (!%p296_p9) }
  0x13   : > { %v683_v5 = vld [vmem:[%s1022_s4 + $0x2] ss:$0 sm:$0xff] (!%p296_p9)  ;;  %v685_v16 = vld [vmem:[%s1022_s4 + $0x3] ss:$0 sm:$0xff] (!%p296_p9)  ;;  %v689_v18 = vld [vmem:[%s1022_s4 + $0x5] ss:$0 sm:$0xff] (!%p296_p9) }
  0x14   : > { %v687_v23 = vld [vmem:[%s1022_s4 + $0x4] ss:$0 sm:$0xff] (!%p296_p9)  ;;  %v692_v35 = vld [vmem:[%s1022_s4 + $0x6] ss:$0 sm:$0xff] (!%p296_p9)  ;;  %v698_v36 = vld [vmem:[%s1022_s4 + $0x8] ss:$0 sm:$0xff] (!%p296_p9) }
  0x15   : > { %v695_v40 = vld [vmem:[%s1022_s4 + $0x7] ss:$0 sm:$0xff] (!%p296_p9)  ;;  %v699_v49 = vld [vmem:[%s1023_s5] ss:$0 sm:$0xff] (!%p296_p9)  ;;  %s341_s22 = sand.u32 (!%p296_p9), 1, %s815_s28   ;;  %s704_s14 = sshll.u32 (!%p296_p9), %s894_s9, 6 }
  0x16   : > { %v700_v53 = vld [vmem:[%s1025_s7] ss:$0 sm:$0xff] (!%p296_p9)  ;;  %vm555_vm3 = vcmask (!%p296_p9), 125952   ;;  %s976_s13 = scalar_lea.hbm (!%p296_p9), %s1026_s8, %s704_s14  ;;  %s827_s18 = smov (!%p296_p9), [#allocation2]  }
  0x17   : > { %v760_v1 = vld [vmem:[%s1032_s6] sm:$0x3f] (!%p296_p9)  }
  0x18   : > { %v512_v2 = vsel (!%p296_p9), %vm510_vm0, %v760_v1, 0 }
  0x19   : > { %s345_s19 = scalar_select %p344_p10, %s894_s9, 7  ;;  %714 = vmatpush3.bf16.msra.mxu0 %v512_v2 }
  0x1a   : > { %s558_s9 = scalar_lea.sflag [#allocation3], %s341_s22 }
  0x1b   : > { %s707_s20 = sshll.u32 %s345_s19, 3 }
  0x1c   : > { %s348_s23 = scalar_lea.vmem %s1033_s0, %s707_s20  ;;  %s353_s26 = scalar_lea.vmem %s1019_s1, %s707_s20 }
  0x1d   : > { %s358_s21 = scalar_lea.vmem %s1020_s2, %s707_s20  ;;  %s363_s24 = scalar_lea.vmem %s1021_s3, %s707_s20  ;;  %v365_v6 = vld [vmem:[%s348_s23] sm:$0x3]  ;;  %v690_v24 = vld [vmem:[%s348_s23 + $0x4] sm:$0x3] }
  0x1e   : > { %v376_v7 = vld [vmem:[%s353_s26] sm:$0x3]  ;;  %v366_v9 = vunpack.c.l.bf16 %v365_v6  ;;  %v696_v25 = vld [vmem:[%s348_s23 + $0x4] sm:$0x7]  ;;  %v444_v33 = vunpack.c.l.bf16 %v690_v24 }
  0x1f   : > { %v388_v8 = vld [vmem:[%s348_s23] sm:$0x7]  ;;  %v377_v10 = vunpack.c.l.bf16 %v376_v7  ;;  %v693_v30 = vld [vmem:[%s353_s26 + $0x4] sm:$0x3]  ;;  %v469_v34 = vunpack.c.l.bf16 %v696_v25  ;;  %s765_s23 = sshll.u32 %s827_s18, 4  ;;  %s766_s23 = int_to_ptr.vmem [resolvable:$false] %s765_s23 }
  0x20   : > { %v389_v11 = vunpack.c.l.bf16 %v388_v8  ;;  %v403_v12 = vld [vmem:[%s358_s21] sm:$0x3]  ;;  %v374_v19 = vmul.f32 %v679_v3, %v366_v9  ;;  %v457_v39 = vunpack.c.l.bf16 %v693_v30  ;;  %v453_v42 = vmul.f32 %v692_v35, %v444_v33  ;;  %s767_s19 = scalar_lea.vmem %s766_s23, 128 }
  0x21   : > { %v415_v13 = vld [vmem:[%s363_s24] sm:$0x3]  ;;  %v404_v15 = vunpack.c.l.bf16 %v403_v12  ;;  %v386_v20 = vmul.f32 %v681_v4, %v377_v10  ;;  %v478_v43 = vmul.f32 %v698_v36, %v469_v34  ;;  %s670_s24 = sshll.u32 %s341_s22, 2 }
  0x22   : > { %v427_v14 = vld [vmem:[%s358_s21] sm:$0x7]  ;;  %v398_v21 = vmul.f32 %v683_v5, %v389_v11  ;;  %v416_v22 = vunpack.c.l.bf16 %v415_v13  ;;  %v466_v45 = vmul.f32 %v695_v40, %v457_v39  ;;  %s343_s10 = scalar_lea.vmem [#allocation2], %s670_s24 }
  0x23   : > { %v428_v17 = vunpack.c.l.bf16 %v427_v14  ;;  %v387_v26 = vadd.f32 %v386_v20, %v374_v19  ;;  %v413_v28 = vmul.f32 %v685_v16, %v404_v15  ;;  %v480_v47 = vrot.slane %v478_v43, 1  ;;  %s571_s0 = sshll.u32 %s343_s10, 4  ;;  %s978_s0 = int_to_ptr.vmem [resolvable:$true] %s571_s0 }
  0x24   : > { %v400_v27 = vrot.slane %v398_v21, 1  ;;  %v425_v32 = vmul.f32 %v687_v23, %v416_v22  ;;  %s761_s17 = scalar_lea.vmem %s978_s0, 64  ;;  %p768_p0 = scmp.lt.s32.totalorder %s978_s0, %s766_s23 }
  0x25   : > { %v437_v29 = vmul.f32 %v689_v18, %v428_v17  ;;  %p762_p11 = scmp.ne.s32.totalorder %s978_s0, %s761_s17  ;;  %p769_p1 = scmp.lt.s32.totalorder %s767_s19, %s761_s17 }
  0x26   : > { %v402_v31 = vadd.f32 %v400_v27, %v387_v26 }
  0x27   : > { %v439_v38 = vrot.slane %v437_v29, 1  ;;  %p763_p12 = pnand %p762_p11, %p911_p5  ;;  %p770_p2 = por %p769_p1, %p768_p0 }
  0x28   : > { %v414_v37 = vadd.f32 %v413_v28, %v402_v31 }
  0x29   : > { %p764_p13 = pneg %p763_p12 }
  0x2a   : > { %v426_v41 = vadd.f32 %v425_v32, %v414_v37 }
  0x2b   : > { %p771_p3 = pnand %p770_p2, %p764_p13 }
  0x2c   : > { %v441_v44 = vadd.f32 %v439_v38, %v426_v41 }
  0x2e   : > { %v454_v46 = vadd.f32 %v453_v42, %v441_v44 }
  0x30   : > { %v467_v48 = vadd.f32 %v466_v45, %v454_v46 }
  0x32   : > { %v482_v50 = vadd.f32 %v480_v47, %v467_v48 }
  0x34   : > { %v490_v51 = vadd.f32 %v699_v49, %v482_v50 }
  0x36   : > { %v491_v52 = vpack.c.bf16 %v490_v51, %v490_v51 }
  0x38   : > { %716 = vmatmul.mubr.msk.bf16.vlgmr.msra.gmra.mrb[0].mxu0 %vm506_vm2, %v491_v52 }
 0x10b   : > { %v548_v54 = vpop.f32.mrb[0].mxu0 }
 0x10c   : > { %v549_v55 = vadd.f32 %v700_v53, %v548_v54  ;;  %v717_v56 = vpop.f32.mrb[1].mxu0 }
 0x10d   : > { %v551_v57 = vpop.f32.mrb[2].mxu0 }
 0x10e   : > { %v554_v58 = vmax.f32 %v549_v55, 0.0  ;;  %v718_v59 = vpop.f32.mrb[3].mxu0 }
 0x110   : > { %556 = vst.msk [vmem:[%s343_s10] sm:$0xf] %vm555_vm3, %v554_v58 }
 0x111   : > { %774 = shalt.err (!%p771_p3)
}
 0x112   : > { %s775_s26 = scalar_lea.hbm %s976_s13, 64  ;;  %s779_s24 = scalar_lea.hbm %s1026_s8, 512 }
 0x113   : > { %p776_p4 = scmp.ne.s32.totalorder %s976_s13, %s775_s26  ;;  %p780_p9 = scmp.lt.u32.totalorder %s976_s13, %s1026_s8 }
 0x114   : > { %p781_p10 = scmp.lt.u32.totalorder %s779_s24, %s775_s26  ;;  %p783_p12 = scmp.lt.u32.totalorder %s775_s26, %s976_s13 }
 0x115   : > { %p777_p7 = pnand %p776_p4, %p911_p5 }
 0x116   : > { %p782_p11 = por %p781_p10, %p780_p9 }
 0x117   : > { %p778_p8 = pneg %p777_p7 }
 0x118   : > { %p784_p13 = por %p783_p12, %p782_p11 }
 0x11a   : > { %p785_p0 = pnand %p784_p13, %p778_p8 }
 0x11c   : > { %788 = shalt.err (!%p785_p0)
}
 0x11d   : > { %719 = dma.vmem_to_hbm [thread:$0]  (%p911_p5), %s978_s0, 64, %s976_s13, %s558_s9  }
 0x11e PF: > { %p725_p1 = scmp.ge.s32.totalorder %s823_s30, 2  ;;  %s583_s14 = sand.u32 1, %s811_s27  }
 0x11f   : > { %s584_s10 = scalar_lea.sflag [#allocation3], %s583_s14 }
 0x120   : > { %p722_p2 = pnand %p725_p1, %p915_p6 }
 0x122   : > { %806 = dma.done.wait (!%p722_p2), %s584_s10, 64  }
 0x123   : > { %808 = vsyncadd (!%p722_p2), %s584_s10, 4294967232  ;;  %s1034_s20 = sld [smem:[#allocation5_spill]]  ;;  %p18_p3 = scmp.ge.s32.totalorder %s898_s11, 10  }
 0x124   : > { %s1035_s27 = smov %s815_s28  ;;  %s1036_s28 = smov %s819_s29 }
 0x125   : > { %s1038_s30 = smov %s898_s11  ;;  %20 = sbr.rel (!%p18_p3) target bundleno = 6 (0x6), region = 106 }
 0x129   : > { %s1037_s29 = smov %s1034_s20 }
 0x12c   :  { %589 = vsyncpa [#allocation3], 1 }
 0x12d   :  { %591 = vsyncpa [#allocation3 + $0x1], 1 }

</bundles_post_ra>
